<compile_context>
chip_gen: v6e
topology: v6e:2x2x1
jax: 0.10.0
libtpu: 0.0.40
codegen_flags: <defaults>
</compile_context>

<pallas_src>
import numpy as np
import jax
import jax.numpy as jnp
from jax import lax
from jax.experimental import pallas as pl
from jax.experimental.pallas import tpu as pltpu


# --------------------------------------------------------------------------
# Host-side (NumPy) face / edge bookkeeping -- identical to the PyTorch code.
# TODO(synk): dict-based edge dedup has no clean Pallas equivalent; kept on host.
# --------------------------------------------------------------------------
def calculate_faces(faces, vn):
    edges = {}
    new_faces = []

    def get_edge_id(e):
        if e not in edges:
            edges[e] = len(edges)
        return edges[e]

    for f in faces:
        a, b, c = int(f[0]), int(f[1]), int(f[2])
        e1, e2, e3 = (tuple(sorted([a, b])), tuple(sorted([b, c])),
                      tuple(sorted([c, a])))
        x = get_edge_id(e1) + vn
        y = get_edge_id(e2) + vn
        z = get_edge_id(e3) + vn
        new_faces.append(np.array([x, y, z]))
        new_faces.append(np.array([a, x, z]))
        new_faces.append(np.array([b, y, x]))
        new_faces.append(np.array([c, z, y]))
    new_faces = np.vstack(new_faces)
    new_vertices_idx = np.vstack([np.array(list(k)) for k in edges.keys()])
    return new_vertices_idx, new_faces


# --------------------------------------------------------------------------
# Pallas kernel: vectorized one-hot select + MXU matmul over an output tile.
# --------------------------------------------------------------------------
def _upsample_kernel(i0_ref, i1_ref, v_ref, o_ref):
    # i0_ref, i1_ref: (1, 1, TN) int32 VMEM -- endpoint ids per output column
    # v_ref:          (1, 3, Vp) f32  VMEM -- channels-first vertex slab
    # o_ref:          (1, 3, TN) f32  VMEM -- channels-first output tile
    vp = v_ref.shape[-1]
    tn = o_ref.shape[-1]

    i0 = i0_ref[0]                                          # (1, TN)
    i1 = i1_ref[0]                                          # (1, TN)
    rows = lax.broadcasted_iota(jnp.int32, (vp, tn), 0)     # vertex id per row

    # sel[v, n] = 0.5 if v is an endpoint of output column n (x2 if i0==i1).
    # 0.0 / 0.5 are exact; the f32 matmul reproduces 0.5*(a+b) bit-exactly
    # because all non-selected contributions are exact zeros.
    sel = ((rows == i0).astype(jnp.float32)
           + (rows == i1).astype(jnp.float32)) * 0.5        # (Vp, TN) VPU work

    verts = v_ref[0]                                        # (3, Vp)
    o_ref[0] = jnp.dot(verts, sel,
                       preferred_element_type=jnp.float32).astype(o_ref.dtype)


def upsample_vertices_pallas(vertices, idx0, idx1, n_out, *, tile_n=128):
    """vertices (B, V, 3); idx0/idx1 (Bi, 1, N_pad) int32 where every output
    column n is 0.5*(v[idx0[n]] + v[idx1[n]]).  Returns (B, n_out, 3)."""
    B, V, C = vertices.shape
    Bi = idx0.shape[0]
    N_pad = idx0.shape[-1]
    assert N_pad % tile_n == 0 and C == 3

    # Channels-first, lane-dense layout; pad V (the contraction / lane axis of
    # the vertex slab) to a multiple of 128.  Padded columns are zero and are
    # never selected (all indices < V), so they contribute nothing.
    Vp = -(-V // 128) * 128
    verts_t = jnp.transpose(vertices, (0, 2, 1))            # (B, 3, V)
    if Vp != V:
        verts_t = jnp.pad(verts_t, ((0, 0), (0, 0), (0, Vp - V)))

    n_tiles = N_pad // tile_n
    idx_map = (lambda b, j: (0, 0, j)) if Bi == 1 else (lambda b, j: (b, 0, j))

    # TODO(synk): for very large meshes (Vp*tile_n sel tile approaching VMEM)
    # add an inner contraction loop over 128/256-wide V tiles; unnecessary at
    # hand-mesh scales (blocks here are a few KiB each).
    out = pl.pallas_call(
        _upsample_kernel,
        out_shape=jax.ShapeDtypeStruct((B, 3, N_pad), vertices.dtype),
        grid=(B, n_tiles),
        in_specs=[
            pl.BlockSpec((1, 1, tile_n), idx_map),
            pl.BlockSpec((1, 1, tile_n), idx_map),
            pl.BlockSpec((1, 3, Vp), lambda b, j: (b, 0, 0)),
        ],
        out_specs=pl.BlockSpec((1, 3, tile_n), lambda b, j: (b, 0, j)),
        compiler_params=pltpu.CompilerParams(
            dimension_semantics=("parallel", "parallel")),
    )(idx0, idx1, verts_t)

    # Back to channels-last and drop the lane padding (layout plumbing only).
    return jnp.transpose(out, (0, 2, 1))[:, :n_out, :]


# --------------------------------------------------------------------------
# Full forward: equivalent of UpSampleLayer.forward(vertices, faces)
# --------------------------------------------------------------------------
def upsample_forward(vertices, faces, *, tile_n=128):
    B, V, _ = vertices.shape
    faces_np = np.asarray(faces)

    idx_list, new_faces_list = [], []
    for i in range(B):
        nvi, nf = calculate_faces(faces_np[i], V)
        idx_list.append(nvi.astype(np.int32))               # (E, 2)
        new_faces_list.append(nf[None])

    edge_counts = {a.shape[0] for a in idx_list}
    assert len(edge_counts) == 1, (
        "batched subdivision requires identical edge counts per batch element")
    E = idx_list[0].shape[0]
    # All endpoint indices must be valid vertex ids (gather has no OOB check).
    for a in idx_list:
        assert a.min() >= 0 and a.max() < V

    shared = all(np.array_equal(idx_list[0], a) for a in idx_list)
    nvi_b = idx_list[0][None] if shared else np.stack(idx_list, axis=0)
    Bi = nvi_b.shape[0]

    # Per-output-column endpoint indices covering [vertex copy | midpoints |
    # padding]: copy columns n<V point at (n, n) so 0.5*(v+v)=v, midpoint
    # columns at the two edge endpoints, sentinel padding columns at (0, 0).
    N = V + E
    N_pad = -(-N // tile_n) * tile_n
    idx0 = np.zeros((Bi, 1, N_pad), dtype=np.int32)
    idx1 = np.zeros((Bi, 1, N_pad), dtype=np.int32)
    idx0[:, 0, :V] = np.arange(V, dtype=np.int32)[None, :]
    idx1[:, 0, :V] = np.arange(V, dtype=np.int32)[None, :]
    idx0[:, 0, V:N] = nvi_b[:, :, 0]
    idx1[:, 0, V:N] = nvi_b[:, :, 1]

    new_faces = jnp.asarray(np.vstack(new_faces_list), dtype=jnp.int32)
    new_verts = upsample_vertices_pallas(
        vertices, jnp.asarray(idx0), jnp.asarray(idx1), N, tile_n=tile_n)
    return new_verts, new_faces


if __name__ == "__main__":
    key = jax.random.PRNGKey(0)

    B, V = 2, 16
    vertices = jax.random.normal(key, (B, V, 3), dtype=jnp.float32)

    # Small deterministic triangle mesh topology, shared across the batch
    # (batched subdivision requires identical edge counts per batch element).
    base_faces = np.array(
        [[0, 1, 2], [0, 2, 3], [0, 3, 4], [0, 4, 5],
         [1, 2, 6], [2, 3, 7], [3, 4, 8], [4, 5, 9]], dtype=np.int32)
    faces = jnp.asarray(np.broadcast_to(base_faces[None], (B,) + base_faces.shape))

    new_verts, new_faces = upsample_forward(vertices, faces)
    jax.block_until_ready(new_verts)
    jax.block_until_ready(new_faces)

    # Reference check (NumPy) against the PyTorch semantics.
    v_np = np.asarray(vertices)
    ref_edge_list, ref_face_list = [], []
    for i in range(B):
        nvi, nf = calculate_faces(np.asarray(faces)[i], V)
        ref_edge_list.append(0.5 * (v_np[i][nvi[:, 0]] + v_np[i][nvi[:, 1]]))
        ref_face_list.append(nf[None])
    ref_new_verts = np.concatenate(
        [v_np, np.stack(ref_edge_list, axis=0)], axis=1)
    ref_new_faces = np.vstack(ref_face_list)

    assert new_verts.shape == ref_new_verts.shape
    assert np.allclose(np.asarray(new_verts), ref_new_verts, atol=1e-5)
    assert np.array_equal(np.asarray(new_faces), ref_new_faces)

    print("KERNEL_OK")
</pallas_src>

<mosaic_0001>
module attributes {stable_mosaic.version = 11 : i64} {
  func.func @_upsample_kernel(%arg0: i32, %arg1: i32, %arg2: memref<1x1x128xi32, #tpu.memory_space<vmem>>, %arg3: memref<1x1x128xi32, #tpu.memory_space<vmem>>, %arg4: memref<1x3x128xf32, #tpu.memory_space<vmem>>, %arg5: memref<1x3x128xf32, #tpu.memory_space<vmem>>) attributes {dimension_semantics = [#tpu.dimension_semantics<parallel>, #tpu.dimension_semantics<parallel>], iteration_bounds = array<i64: 2, 1>, scalar_prefetch = 0 : i64, scratch_operands = 0 : i64, tpu.core_type = #tpu.core_type<tc>, window_params = [{transform_indices = @transform_0, window_bounds = array<i64: 1, 1, 128>}, {transform_indices = @transform_1, window_bounds = array<i64: 1, 1, 128>}, {transform_indices = @transform_2, window_bounds = array<i64: 1, 3, 128>}, {transform_indices = @transform_3, window_bounds = array<i64: 1, 3, 128>}]} {
    %c0 = arith.constant 0 : index
    %c0_0 = arith.constant 0 : index
    %c0_1 = arith.constant 0 : index
    %0 = vector.load %arg2[%c0, %c0_0, %c0_1] : memref<1x1x128xi32, #tpu.memory_space<vmem>>, vector<1x1x128xi32>
    %1 = vector.shape_cast %0 : vector<1x1x128xi32> to vector<1x128xi32>
    %c0_2 = arith.constant 0 : index
    %c0_3 = arith.constant 0 : index
    %c0_4 = arith.constant 0 : index
    %2 = vector.load %arg3[%c0_2, %c0_3, %c0_4] : memref<1x1x128xi32, #tpu.memory_space<vmem>>, vector<1x1x128xi32>
    %3 = vector.shape_cast %2 : vector<1x1x128xi32> to vector<1x128xi32>
    %4 = tpu.iota {dimensions = array<i32: 0>} : vector<128x128xi32>
    %5 = vector.broadcast %1 : vector<1x128xi32> to vector<128x128xi32>
    %6 = arith.cmpi eq, %4, %5 : vector<128x128xi32>
    %7 = arith.extui %6 : vector<128x128xi1> to vector<128x128xi32>
    %8 = arith.sitofp %7 : vector<128x128xi32> to vector<128x128xf32>
    %9 = vector.broadcast %3 : vector<1x128xi32> to vector<128x128xi32>
    %10 = arith.cmpi eq, %4, %9 : vector<128x128xi32>
    %11 = arith.extui %10 : vector<128x128xi1> to vector<128x128xi32>
    %12 = arith.sitofp %11 : vector<128x128xi32> to vector<128x128xf32>
    %13 = arith.addf %8, %12 : vector<128x128xf32>
    %cst = arith.constant 5.000000e-01 : f32
    %14 = vector.broadcast %cst : f32 to vector<128x128xf32>
    %15 = arith.mulf %13, %14 : vector<128x128xf32>
    %c0_5 = arith.constant 0 : index
    %c0_6 = arith.constant 0 : index
    %c0_7 = arith.constant 0 : index
    %16 = vector.load %arg4[%c0_5, %c0_6, %c0_7] : memref<1x3x128xf32, #tpu.memory_space<vmem>>, vector<1x3x128xf32>
    %17 = vector.shape_cast %16 : vector<1x3x128xf32> to vector<3x128xf32>
    %cst_8 = arith.constant dense<0.000000e+00> : vector<3x128xf32>
    %18 = tpu.matmul %17, %15, %cst_8 {dimension_numbers = #tpu.dot_dimension_numbers<[1], [0], [0], [1], [0, 0, 1, 1], [], []>} : vector<3x128xf32>, vector<128x128xf32>, vector<3x128xf32> -> vector<3x128xf32>
    %c0_9 = arith.constant 0 : index
    %c0_10 = arith.constant 0 : index
    %c0_11 = arith.constant 0 : index
    %19 = vector.load %arg5[%c0_9, %c0_10, %c0_11] : memref<1x3x128xf32, #tpu.memory_space<vmem>>, vector<1x3x128xf32>
    %20 = vector.shape_cast %19 : vector<1x3x128xf32> to vector<3x128xf32>
    %21 = vector.shape_cast %18 : vector<3x128xf32> to vector<1x3x128xf32>
    tpu.vector_store %arg5[%c0_9, %c0_10, %c0_11], %21 {strides = array<i32>} : memref<1x3x128xf32, #tpu.memory_space<vmem>>, vector<1x3x128xf32>,
    return
  }
  func.func @transform_0(%arg0: i32, %arg1: i32) -> (i32, i32, i32) {
    %c0_i32 = arith.constant 0 : i32
    %c0_i32_0 = arith.constant 0 : i32
    %c0_i32_1 = arith.constant 0 : i32
    return %c0_i32, %c0_i32_0, %arg1 : i32, i32, i32
  }
  func.func @transform_1(%arg0: i32, %arg1: i32) -> (i32, i32, i32) {
    %c0_i32 = arith.constant 0 : i32
    %c0_i32_0 = arith.constant 0 : i32
    %c0_i32_1 = arith.constant 0 : i32
    return %c0_i32, %c0_i32_0, %arg1 : i32, i32, i32
  }
  func.func @transform_2(%arg0: i32, %arg1: i32) -> (i32, i32, i32) {
    %c0_i32 = arith.constant 0 : i32
    %c0_i32_0 = arith.constant 0 : i32
    %c0_i32_1 = arith.constant 0 : i32
    return %arg0, %c0_i32, %c0_i32_0 : i32, i32, i32
  }
  func.func @transform_3(%arg0: i32, %arg1: i32) -> (i32, i32, i32) {
    %c0_i32 = arith.constant 0 : i32
    %c0_i32_0 = arith.constant 0 : i32
    return %arg0, %c0_i32, %arg1 : i32, i32, i32
  }
}

</mosaic_0001>

<bundles_post_ra>
// kernel: tpu_custom_call.1
= control target key start
LH: loop header
LB: loop body
LE: loop exit
PB: predicated region body
PF: predicated region fallthrough
CT: control target
= control target key end

     0   :  { %s706_s12 = smov 0   ;;  %s708_s13 = smov 0   ;;  %s858_s0 = inlined_call_operand.vmem [shape: s32[1,1,128], index: 0, kind: input, shape index: {}]   ;;  %s859_s1 = inlined_call_operand.vmem [shape: s32[1,1,128], index: 1, kind: input, shape index: {}]   ;;  %s860_s2 = inlined_call_operand.vmem [shape: f32[2,3,128], index: 2, kind: input, shape index: {}]   ;;  %s861_s3 = inlined_call_operand.vmem [shape: f32[2,3,128], index: 3, kind: output, shape index: {}]  }
   0x1   :  { %s710_s14 = smov 0  }
   0x2 LB: > { %s25_s15 = sadd.s32 1, %s678_s13  ;;  %p543_p0 = scmp.ge.s32.totalorder %s682_s14, 1  ;;  %s682_s14 = sphi %s710_s14, %s13_s14   ;;  %s678_s13 = sphi %s708_s13, %s863_s13   ;;  %s674_s12 = sphi %s706_s12, %s862_s12  }
   0x3   : > { %p27_p1 = scmp.ge.s32.totalorder %s25_s15, 2  ;;  %p166_p2 = scmp.lt.s32.totalorder %s682_s14, 3 }
   0x5   : > { %s865_s15 = smov (%p27_p1, %s25_s15), 0  ;;  %p167_p3 = pnand %p543_p0, %p166_p2 }
   0x6   : > { %p203_p4 = scmp.lt.s32.totalorder (!%p167_p3), %s674_s12, 1 }
   0x7   : > { %170 = sbr.rel (%p167_p3) target bundleno = 250 (0xfa), region = 32 }
   0xc   : > { %v216_v0 = vlaneseq  ;;  %v684_v1 = vmov 0.0   ;;  %vm685_vm0 = vmmov 0   ;;  %v733_v3 = vld [vmem:[%s858_s0] ss:$0 sm:$0xff]  ;;  %s867_s12 = smov (!%p203_p4, %s674_s12), 1 }
   0xd   : > { %599 = vmatprep.subr.mxu0 %v684_v1  ;;  %631 = vmatprep.mubr.msk.f32.mxu0 %vm685_vm0, %v684_v1  ;;  %v738_v4 = vld [vmem:[%s859_s1] ss:$0 sm:$0xff]  ;;  %s544_s20 = sshll.u32 %s867_s12, 2 }
   0xe   : > { %v728_v2 = vshrl.u32 %v216_v0, 7  ;;  %s206_s23 = scalar_lea.vmem %s860_s2, %s544_s20  ;;  %s213_s26 = scalar_lea.vmem %s861_s3, %s544_s20 }
  0x10   : > { %v232_v5 = vadd.s32 120, %v728_v2  ;;  %v231_v6 = vadd.s32 112, %v728_v2  ;;  %v230_v7 = vadd.s32 104, %v728_v2  ;;  %v229_v8 = vadd.s32 96, %v728_v2 }
  0x11   : > { %v228_v9 = vadd.s32 88, %v728_v2  ;;  %v227_v10 = vadd.s32 80, %v728_v2  ;;  %v226_v11 = vadd.s32 72, %v728_v2  ;;  %v225_v12 = vadd.s32 64, %v728_v2 }
  0x12   : > { %vm252_vm1 = vcmp.eq.s32.totalorder %v232_v5, %v733_v3  ;;  %vm304_vm2 = vcmp.eq.s32.totalorder %v232_v5, %v738_v4  ;;  %vm251_vm3 = vcmp.eq.s32.totalorder %v231_v6, %v733_v3  ;;  %vm303_vm4 = vcmp.eq.s32.totalorder %v231_v6, %v738_v4 }
  0x13   : > { %v562_v13 = vsel %vm252_vm1, 1.0, %v684_v1  ;;  %v579_v14 = vsel %vm304_vm2, 1.0, %v684_v1  ;;  %v561_v15 = vsel %vm251_vm3, 1.0, %v684_v1  ;;  %v578_v16 = vsel %vm303_vm4, 1.0, %v684_v1 }
  0x14   : > { %v352_v17 = vadd.f32 %v579_v14, %v562_v13  ;;  %v351_v18 = vadd.f32 %v578_v16, %v561_v15  ;;  %vm250_vm5 = vcmp.eq.s32.totalorder %v230_v7, %v733_v3  ;;  %vm302_vm6 = vcmp.eq.s32.totalorder %v230_v7, %v738_v4 }
  0x15   : > { %v560_v19 = vsel %vm250_vm5, 1.0, %v684_v1  ;;  %v577_v20 = vsel %vm302_vm6, 1.0, %v684_v1  ;;  %vm249_vm7 = vcmp.eq.s32.totalorder %v229_v8, %v733_v3  ;;  %vm301_vm8 = vcmp.eq.s32.totalorder %v229_v8, %v738_v4 }
  0x16   : > { %v368_v21 = vmul.f32 0.5, %v352_v17  ;;  %v367_v22 = vmul.f32 0.5, %v351_v18  ;;  %v350_v23 = vadd.f32 %v577_v20, %v560_v19  ;;  %v559_v24 = vsel %vm249_vm7, 1.0, %v684_v1 }
  0x17   : > { %v576_v25 = vsel %vm301_vm8, 1.0, %v684_v1  ;;  %vm248_vm9 = vcmp.eq.s32.totalorder %v228_v9, %v733_v3  ;;  %vm300_vm10 = vcmp.eq.s32.totalorder %v228_v9, %v738_v4  ;;  %vm247_vm11 = vcmp.eq.s32.totalorder %v227_v10, %v733_v3 }
  0x18   : > { %600 = vmatpush3.msra.mxu0 %v368_v21  ;;  %v366_v26 = vmul.f32 0.5, %v350_v23  ;;  %v349_v27 = vadd.f32 %v576_v25, %v559_v24  ;;  %v558_v28 = vsel %vm248_vm9, 1.0, %v684_v1  ;;  %v575_v29 = vsel %vm300_vm10, 1.0, %v684_v1 }
  0x19   : > { %601 = vmatprep.subr.mxu0 %v684_v1  ;;  %v348_v30 = vadd.f32 %v575_v29, %v558_v28  ;;  %v557_v31 = vsel %vm247_vm11, 1.0, %v684_v1  ;;  %vm299_vm12 = vcmp.eq.s32.totalorder %v227_v10, %v738_v4  ;;  %vm246_vm13 = vcmp.eq.s32.totalorder %v226_v11, %v733_v3 }
  0x1a   : > { %602 = vmatpush3.msra.mxu0 %v367_v22  ;;  %v365_v32 = vmul.f32 0.5, %v349_v27  ;;  %v574_v33 = vsel %vm299_vm12, 1.0, %v684_v1  ;;  %v556_v34 = vsel %vm246_vm13, 1.0, %v684_v1  ;;  %vm298_vm14 = vcmp.eq.s32.totalorder %v226_v11, %v738_v4 }
  0x1b   : > { %603 = vmatprep.subr.mxu0 %v684_v1  ;;  %v364_v35 = vmul.f32 0.5, %v348_v30  ;;  %v347_v36 = vadd.f32 %v574_v33, %v557_v31  ;;  %v573_v37 = vsel %vm298_vm14, 1.0, %v684_v1  ;;  %vm245_vm15 = vcmp.eq.s32.totalorder %v225_v12, %v733_v3 }
  0x1c   : > { %604 = vmatpush3.msra.mxu0 %v366_v26  ;;  %v346_v38 = vadd.f32 %v573_v37, %v556_v34  ;;  %v555_v39 = vsel %vm245_vm15, 1.0, %v684_v1  ;;  %vm297_vm0 = vcmp.eq.s32.totalorder %v225_v12, %v738_v4  ;;  %v224_v40 = vadd.s32 56, %v728_v2 }
  0x1d   : > { %605 = vmatprep.subr.mxu0 %v684_v1  ;;  %v572_v41 = vsel %vm297_vm0, 1.0, %v684_v1  ;;  %v223_v42 = vadd.s32 48, %v728_v2  ;;  %v222_v43 = vadd.s32 40, %v728_v2  ;;  %v363_v44 = vmul.f32 0.5, %v347_v36 }
  0x1e   : > { %606 = vmatpush3.msra.mxu0 %v365_v32  ;;  %v345_v45 = vadd.f32 %v572_v41, %v555_v39  ;;  %vm244_vm1 = vcmp.eq.s32.totalorder %v224_v40, %v733_v3  ;;  %vm296_vm2 = vcmp.eq.s32.totalorder %v224_v40, %v738_v4  ;;  %v362_v48 = vmul.f32 0.5, %v346_v38 }
  0x1f   : > { %607 = vmatprep.subr.mxu0 %v684_v1  ;;  %v554_v46 = vsel %vm244_vm1, 1.0, %v684_v1  ;;  %v571_v47 = vsel %vm296_vm2, 1.0, %v684_v1  ;;  %vm243_vm3 = vcmp.eq.s32.totalorder %v223_v42, %v733_v3  ;;  %vm295_vm4 = vcmp.eq.s32.totalorder %v223_v42, %v738_v4 }
  0x20   : > { %608 = vmatpush3.msra.mxu0 %v364_v35  ;;  %v344_v49 = vadd.f32 %v571_v47, %v554_v46  ;;  %v553_v50 = vsel %vm243_vm3, 1.0, %v684_v1  ;;  %v570_v51 = vsel %vm295_vm4, 1.0, %v684_v1  ;;  %v361_v52 = vmul.f32 0.5, %v345_v45 }
  0x21   : > { %609 = vmatprep.subr.mxu0 %v684_v1  ;;  %vm242_vm5 = vcmp.eq.s32.totalorder %v222_v43, %v733_v3  ;;  %vm294_vm6 = vcmp.eq.s32.totalorder %v222_v43, %v738_v4  ;;  %v221_v53 = vadd.s32 32, %v728_v2  ;;  %v343_v54 = vadd.f32 %v570_v51, %v553_v50 }
  0x22   : > { %610 = vmatpush3.msra.mxu0 %v363_v44  ;;  %v552_v55 = vsel %vm242_vm5, 1.0, %v684_v1  ;;  %v569_v56 = vsel %vm294_vm6, 1.0, %v684_v1  ;;  %v220_v57 = vadd.s32 24, %v728_v2  ;;  %v360_v58 = vmul.f32 0.5, %v344_v49 }
  0x23   : > { %611 = vmatprep.subr.mxu0 %v684_v1  ;;  %v342_v59 = vadd.f32 %v569_v56, %v552_v55  ;;  %vm241_vm7 = vcmp.eq.s32.totalorder %v221_v53, %v733_v3  ;;  %vm293_vm8 = vcmp.eq.s32.totalorder %v221_v53, %v738_v4  ;;  %v359_v0 = vmul.f32 0.5, %v343_v54 }
  0x24   : > { %612 = vmatpush3.msra.mxu0 %v362_v48  ;;  %v551_v60 = vsel %vm241_vm7, 1.0, %v684_v1  ;;  %v568_v61 = vsel %vm293_vm8, 1.0, %v684_v1  ;;  %vm240_vm9 = vcmp.eq.s32.totalorder %v220_v57, %v733_v3  ;;  %vm292_vm10 = vcmp.eq.s32.totalorder %v220_v57, %v738_v4 }
  0x25   : > { %613 = vmatprep.subr.mxu0 %v684_v1  ;;  %v550_v62 = vsel %vm240_vm9, 1.0, %v684_v1  ;;  %v567_v63 = vsel %vm292_vm10, 1.0, %v684_v1  ;;  %v341_v5 = vadd.f32 %v568_v61, %v551_v60  ;;  %v219_v6 = vadd.s32 16, %v728_v2 }
  0x26   : > { %614 = vmatpush3.msra.mxu0 %v361_v52  ;;  %v218_v7 = vadd.s32 8, %v728_v2  ;;  %v358_v8 = vmul.f32 0.5, %v342_v59  ;;  %v340_v9 = vadd.f32 %v567_v63, %v550_v62  ;;  %vm237_vm11 = vcmp.eq.s32.totalorder %v728_v2, %v733_v3 }
  0x27   : > { %615 = vmatprep.subr.mxu0 %v684_v1  ;;  %vm239_vm12 = vcmp.eq.s32.totalorder %v219_v6, %v733_v3  ;;  %vm291_vm13 = vcmp.eq.s32.totalorder %v219_v6, %v738_v4  ;;  %vm289_vm15 = vcmp.eq.s32.totalorder %v728_v2, %v738_v4  ;;  %v357_v13 = vmul.f32 0.5, %v341_v5 }
  0x28   : > { %616 = vmatpush3.msra.mxu0 %v360_v58  ;;  %vm238_vm14 = vcmp.eq.s32.totalorder %v218_v7, %v733_v3  ;;  %v549_v10 = vsel %vm239_vm12, 1.0, %v684_v1  ;;  %v566_v11 = vsel %vm291_vm13, 1.0, %v684_v1  ;;  %vm290_vm0 = vcmp.eq.s32.totalorder %v218_v7, %v738_v4  ;;  %v369_v3 = vld [vmem:[%s206_s23] sm:$0x7] }
  0x29   : > { %617 = vmatprep.subr.mxu0 %v684_v1  ;;  %v548_v12 = vsel %vm238_vm14, 1.0, %v684_v1  ;;  %v339_v14 = vadd.f32 %v566_v11, %v549_v10  ;;  %v565_v15 = vsel %vm290_vm0, 1.0, %v684_v1  ;;  %v547_v16 = vsel %vm237_vm11, 1.0, %v684_v1 }
  0x2a   : > { %618 = vmatpush3.msra.mxu0 %v359_v0  ;;  %v564_v17 = vsel %vm289_vm15, 1.0, %v684_v1  ;;  %v356_v18 = vmul.f32 0.5, %v340_v9  ;;  %v338_v19 = vadd.f32 %v565_v15, %v548_v12 }
  0x2b   : > { %619 = vmatprep.subr.mxu0 %v684_v1  ;;  %v355_v4 = vmul.f32 0.5, %v339_v14  ;;  %v337_v20 = vadd.f32 %v564_v17, %v547_v16 }
  0x2c   : > { %620 = vmatpush3.msra.mxu0 %v358_v8  ;;  %v354_v21 = vmul.f32 0.5, %v338_v19 }
  0x2d   : > { %621 = vmatprep.subr.mxu0 %v684_v1  ;;  %v353_v2 = vmul.f32 0.5, %v337_v20 }
  0x2e   : > { %622 = vmatpush3.msra.mxu0 %v357_v13 }
  0x2f   : > { %623 = vmatprep.subr.mxu0 %v684_v1 }
  0x30   : > { %624 = vmatpush3.msra.mxu0 %v356_v18 }
  0x31   : > { %625 = vmatprep.subr.mxu0 %v684_v1 }
  0x32   : > { %626 = vmatpush3.msra.mxu0 %v355_v4 }
  0x33   : > { %627 = vmatprep.subr.mxu0 %v684_v1 }
  0x34   : > { %628 = vmatpush3.msra.mxu0 %v354_v21 }
  0x35   : > { %629 = vmatprep.subr.mxu0 %v684_v1 }
  0x36   : > { %630 = vmatpush3.msra.mxu0 %v353_v2 }
  0x37   : > { %632 = vmatmul.mubr.f32.vlgmr.msra.gmra.mxu0 %v369_v3 }
  0xf7   : > { %v436_v22 = vpop.f32.mrf.mxu0 }
  0xf8   : > { %440 = vst [vmem:[%s213_s26] sm:$0x7] %v436_v22 }
  0xf9   : > { %v633_v23 = vpop.f32.mrf.mxu0 }
  0xfa PF: > { %s13_s14 = sadd.s32 1, %s682_s14   ;;  %s862_s12 = smov %s678_s13 }
  0xfb   : > { %p10_p5 = scmp.ge.s32.totalorder %s13_s14, 4   ;;  %s863_s13 = smov %s865_s15 }
  0xfd   :  { %12 = sbr.rel (!%p10_p5) target bundleno = 2 (0x2), region = 68 }

</bundles_post_ra>
